<compile_context>
chip_gen: v6e
topology: v6e:2x2x1
jax: 0.10.0
libtpu: 0.0.40
codegen_flags: <defaults>
</compile_context>

<pallas_src>
import functools
import math

import jax
import jax.numpy as jnp
from jax.experimental import pallas as pl
from jax.experimental.pallas import tpu as pltpu


def _smooth_kld_kernel(tgt_ref, x_ref, o_ref, *, pad_idx, fill_val, confidence,
                       k_fill, k_conf, block_v, mask_pad):
    """loss = k - c * x, with c/k selected per element from 3 constant values."""
    x = x_ref[...].astype(jnp.float32)                    # [TN, TV] log-probs (f32 math)
    tgt = tgt_ref[...]                                     # [TN, 1] int32

    # Tile-local column indices: iota is loop-invariant; only the cheap scalar /
    # [TN,1] offsets change across vocab tiles (no full-tile int add).
    col = jax.lax.broadcasted_iota(jnp.int32, x.shape, dimension=1)
    off = pl.program_id(1) * block_v
    pad_local = pad_idx - off                              # scalar
    tgt_local = tgt - off                                  # [TN, 1]

    if mask_pad:
        # Fold whole-row zeroing for pad targets into the per-row coefficients.
        row_pad = tgt == pad_idx                           # [TN, 1]
        c_fill_r = jnp.where(row_pad, 0.0, fill_val)
        k_fill_r = jnp.where(row_pad, 0.0, k_fill)
        c_conf_r = jnp.where(row_pad, 0.0, confidence)
        k_conf_r = jnp.where(row_pad, 0.0, k_conf)
    else:
        c_fill_r, k_fill_r = jnp.float32(fill_val), jnp.float32(k_fill)
        c_conf_r, k_conf_r = jnp.float32(confidence), jnp.float32(k_conf)

    is_tgt = col == tgt_local                              # scatter column (wins over pad col)
    is_pad = col == pad_local                              # pad column zeroed unless target

    c = jnp.where(is_tgt, c_conf_r, jnp.where(is_pad, 0.0, c_fill_r))
    k = jnp.where(is_tgt, k_conf_r, jnp.where(is_pad, 0.0, k_fill_r))
    o_ref[...] = (k - c * x).astype(o_ref.dtype)


def _pick_block(dim, want, align):
    b = min(want, dim)
    if b == dim:
        return b
    if b >= align:
        return (b // align) * align
    return dim            # too small to tile cleanly -> take the full dim


def smooth_kld_pallas(x, target, *, vocab_size, pad_idx, smoothing=0.1,
                      mask_pad=True, block_n=256, block_v=None, donate_x=False):
    """Label-smoothed KLDivLoss(reduction='none'); returns [N, V] like PyTorch."""
    assert 0.0 <= smoothing <= 1.0
    N, V = x.shape
    assert V == vocab_size
    assert target.shape[0] == N

    fill_val = float(smoothing) / (vocab_size - 2)
    confidence = 1.0 - float(smoothing)

    itemsize = jnp.dtype(x.dtype).itemsize
    if block_v is None:
        block_v = 4096 if itemsize <= 2 else 2048          # bf16 -> wider vocab tiles

    block_n = _pick_block(N, block_n, 8)                    # sublane-aligned rows
    block_v = _pick_block(V, block_v, 128)                  # lane-aligned cols
    # If the whole problem fits one tile, split rows so 2 TensorCores both work (v7x).
    if N >= 16 and pl.cdiv(N, block_n) * pl.cdiv(V, block_v) < 2:
        block_n = max(8, (N // 2) // 8 * 8)
    grid = (pl.cdiv(N, block_n), pl.cdiv(V, block_v))

    tgt2 = target.reshape(N, 1).astype(jnp.int32)

    kernel = functools.partial(
        _smooth_kld_kernel,
        pad_idx=int(pad_idx), fill_val=fill_val, confidence=confidence,
        k_fill=fill_val * math.log(fill_val) if fill_val > 0.0 else 0.0,
        k_conf=confidence * math.log(confidence) if confidence > 0.0 else 0.0,
        block_v=block_v, mask_pad=bool(mask_pad))

    # VMEM budget: double-buffered x + out tiles + padded [TN,1] target buffers + slack.
    tile_bytes = block_n * block_v * itemsize
    vmem_limit = max(32 << 20,
                     min(4 * tile_bytes + 2 * block_n * 128 * 4 + (8 << 20), 48 << 20))

    cost = pl.CostEstimate(flops=5 * N * V, transcendentals=0,
                           bytes_accessed=2 * N * V * itemsize + N * 4)

    return pl.pallas_call(
        kernel,
        out_shape=jax.ShapeDtypeStruct((N, V), x.dtype),
        grid=grid,
        in_specs=[
            # targets: tiny [TN,1] tile, block index constant across the vocab axis.
            pl.BlockSpec((block_n, 1), lambda i, j: (i, 0)),
            pl.BlockSpec((block_n, block_v), lambda i, j: (i, j)),   # x
        ],
        out_specs=pl.BlockSpec((block_n, block_v), lambda i, j: (i, j)),
        compiler_params=pltpu.CompilerParams(
            dimension_semantics=("parallel", "parallel"),
            vmem_limit_bytes=vmem_limit),
        cost_estimate=cost,
        input_output_aliases={1: 0} if donate_x else {},
    )(tgt2, x)


def _reference_smooth_kld(x, target, *, vocab_size, pad_idx, smoothing, mask_pad=True):
    """Pure-JAX mirror of the PyTorch SmoothKLD.forward."""
    fill_val = smoothing / (vocab_size - 2)
    confidence = 1.0 - smoothing
    N, V = x.shape
    truth = jnp.full((N, V), fill_val, dtype=jnp.float32)
    truth = truth.at[:, pad_idx].set(0.0)
    truth = truth.at[jnp.arange(N), target].set(confidence)     # scatter_
    if mask_pad:
        truth = jnp.where((target == pad_idx)[:, None], 0.0, truth)
    xf = x.astype(jnp.float32)
    loss = jnp.where(truth > 0, truth * (jnp.log(truth) - xf), 0.0)
    return loss.astype(x.dtype)


if __name__ == "__main__":
    # Small deterministic problem: flattened batch*seq = 16 rows, vocab = 256.
    N, V = 16, 256
    pad_idx = 0
    smoothing = 0.1

    key = jax.random.PRNGKey(0)
    k_logits, k_tgt = jax.random.split(key)

    logits = jax.random.normal(k_logits, (N, V), dtype=jnp.float32)
    x = jax.nn.log_softmax(logits, axis=-1)                      # input_type='log_softmax'
    target = jax.random.randint(k_tgt, (N,), 1, V, dtype=jnp.int32)
    target = target.at[0].set(pad_idx)                           # exercise pad masking
    target = target.at[1].set(pad_idx)

    loss = smooth_kld_pallas(x, target, vocab_size=V, pad_idx=pad_idx,
                             smoothing=smoothing, mask_pad=True)
    loss = jax.block_until_ready(loss)

    ref = _reference_smooth_kld(x, target, vocab_size=V, pad_idx=pad_idx,
                                smoothing=smoothing, mask_pad=True)
    assert loss.shape == (N, V)
    assert jnp.allclose(loss, ref, atol=1e-5, rtol=1e-5), (
        float(jnp.max(jnp.abs(loss - ref))))

    # Also check mask_pad=False path (pad rows keep confidence at the pad column).
    loss_nm = jax.block_until_ready(
        smooth_kld_pallas(x, target, vocab_size=V, pad_idx=pad_idx,
                          smoothing=smoothing, mask_pad=False))
    ref_nm = _reference_smooth_kld(x, target, vocab_size=V, pad_idx=pad_idx,
                                   smoothing=smoothing, mask_pad=False)
    assert jnp.allclose(loss_nm, ref_nm, atol=1e-5, rtol=1e-5)

    print("KERNEL_OK")
</pallas_src>

<mosaic_0001>
module attributes {stable_mosaic.version = 11 : i64} {
  func.func @_smooth_kld_kernel(%arg0: i32, %arg1: i32, %arg2: memref<8x1xi32, #tpu.memory_space<vmem>>, %arg3: memref<8x256xf32, #tpu.memory_space<vmem>>, %arg4: memref<8x256xf32, #tpu.memory_space<vmem>>) attributes {dimension_semantics = [#tpu.dimension_semantics<parallel>, #tpu.dimension_semantics<parallel>], iteration_bounds = array<i64: 2, 1>, scalar_prefetch = 0 : i64, scratch_operands = 0 : i64, tpu.core_type = #tpu.core_type<tc>, window_params = [{transform_indices = @transform_0, window_bounds = array<i64: 8, 1>}, {transform_indices = @transform_1, window_bounds = array<i64: 8, 256>}, {transform_indices = @transform_2, window_bounds = array<i64: 8, 256>}]} {
    %c0 = arith.constant 0 : index
    %c0_0 = arith.constant 0 : index
    %0 = vector.load %arg3[%c0, %c0_0] : memref<8x256xf32, #tpu.memory_space<vmem>>, vector<8x256xf32>
    %c0_1 = arith.constant 0 : index
    %c0_2 = arith.constant 0 : index
    %1 = vector.load %arg2[%c0_1, %c0_2] : memref<8x1xi32, #tpu.memory_space<vmem>>, vector<8x1xi32>
    %2 = tpu.iota {dimensions = array<i32: 1>} : vector<8x256xi32>
    %c256_i32 = arith.constant 256 : i32
    %3 = arith.muli %arg1, %c256_i32 : i32
    %c0_i32 = arith.constant 0 : i32
    %4 = arith.subi %c0_i32, %3 : i32
    %5 = vector.broadcast %3 : i32 to vector<8x1xi32>
    %6 = arith.subi %1, %5 : vector<8x1xi32>
    %c0_i32_3 = arith.constant 0 : i32
    %7 = vector.broadcast %c0_i32_3 : i32 to vector<8x1xi32>
    %8 = arith.cmpi eq, %1, %7 : vector<8x1xi32>
    %cst = arith.constant 0.000000e+00 : f32
    %cst_4 = arith.constant 3.93700786E-4 : f32
    %9 = vector.broadcast %cst : f32 to vector<8x1xf32>
    %10 = vector.broadcast %cst_4 : f32 to vector<8x1xf32>
    %11 = arith.select %8, %9, %10 : vector<8x1xi1>, vector<8x1xf32>
    %cst_5 = arith.constant 0.000000e+00 : f32
    %cst_6 = arith.constant -0.00308658252 : f32
    %12 = vector.broadcast %cst_5 : f32 to vector<8x1xf32>
    %13 = vector.broadcast %cst_6 : f32 to vector<8x1xf32>
    %14 = arith.select %8, %12, %13 : vector<8x1xi1>, vector<8x1xf32>
    %cst_7 = arith.constant 0.000000e+00 : f32
    %cst_8 = arith.constant 0.899999976 : f32
    %15 = vector.broadcast %cst_7 : f32 to vector<8x1xf32>
    %16 = vector.broadcast %cst_8 : f32 to vector<8x1xf32>
    %17 = arith.select %8, %15, %16 : vector<8x1xi1>, vector<8x1xf32>
    %cst_9 = arith.constant 0.000000e+00 : f32
    %cst_10 = arith.constant -0.0948244631 : f32
    %18 = vector.broadcast %cst_9 : f32 to vector<8x1xf32>
    %19 = vector.broadcast %cst_10 : f32 to vector<8x1xf32>
    %20 = arith.select %8, %18, %19 : vector<8x1xi1>, vector<8x1xf32>
    %21 = vector.broadcast %6 : vector<8x1xi32> to vector<8x256xi32>
    %22 = arith.cmpi eq, %2, %21 : vector<8x256xi32>
    %23 = vector.broadcast %4 : i32 to vector<8x256xi32>
    %24 = arith.cmpi eq, %2, %23 : vector<8x256xi32>
    %cst_11 = arith.constant 0.000000e+00 : f32
    %25 = vector.broadcast %cst_11 : f32 to vector<8x256xf32>
    %26 = vector.shape_cast %11 : vector<8x1xf32> to vector<8x1xf32>
    %27 = vector.broadcast %26 : vector<8x1xf32> to vector<8x256xf32>
    %28 = arith.select %24, %25, %27 : vector<8x256xi1>, vector<8x256xf32>
    %29 = vector.shape_cast %17 : vector<8x1xf32> to vector<8x1xf32>
    %30 = vector.broadcast %29 : vector<8x1xf32> to vector<8x256xf32>
    %31 = arith.select %22, %30, %28 : vector<8x256xi1>, vector<8x256xf32>
    %cst_12 = arith.constant 0.000000e+00 : f32
    %32 = vector.broadcast %cst_12 : f32 to vector<8x256xf32>
    %33 = vector.shape_cast %14 : vector<8x1xf32> to vector<8x1xf32>
    %34 = vector.broadcast %33 : vector<8x1xf32> to vector<8x256xf32>
    %35 = arith.select %24, %32, %34 : vector<8x256xi1>, vector<8x256xf32>
    %36 = vector.shape_cast %20 : vector<8x1xf32> to vector<8x1xf32>
    %37 = vector.broadcast %36 : vector<8x1xf32> to vector<8x256xf32>
    %38 = arith.select %22, %37, %35 : vector<8x256xi1>, vector<8x256xf32>
    %39 = arith.mulf %31, %0 : vector<8x256xf32>
    %40 = arith.subf %38, %39 : vector<8x256xf32>
    %c0_13 = arith.constant 0 : index
    %c0_14 = arith.constant 0 : index
    %41 = vector.load %arg4[%c0_13, %c0_14] : memref<8x256xf32, #tpu.memory_space<vmem>>, vector<8x256xf32>
    tpu.vector_store %arg4[%c0_13, %c0_14], %40 {strides = array<i32>} : memref<8x256xf32, #tpu.memory_space<vmem>>, vector<8x256xf32>,
    return
  }
  func.func @transform_0(%arg0: i32, %arg1: i32) -> (i32, i32) {
    %c0_i32 = arith.constant 0 : i32
    %c0_i32_0 = arith.constant 0 : i32
    return %arg0, %c0_i32 : i32, i32
  }
  func.func @transform_1(%arg0: i32, %arg1: i32) -> (i32, i32) {
    %c0_i32 = arith.constant 0 : i32
    return %arg0, %arg1 : i32, i32
  }
  func.func @transform_2(%arg0: i32, %arg1: i32) -> (i32, i32) {
    %c0_i32 = arith.constant 0 : i32
    return %arg0, %arg1 : i32, i32
  }
}

</mosaic_0001>

<bundles_post_ra>
// kernel: tpu_custom_call.1
= control target key start
LH: loop header
LB: loop body
LE: loop exit
PB: predicated region body
PF: predicated region fallthrough
CT: control target
= control target key end

     0   :  { %7 = vsyncpa [#allocation3], 0  ;;  %s741_s0 = inlined_call_operand.vmem [shape: s32[16,1], index: 0, kind: input, shape index: {}]   ;;  %s742_s1 = inlined_call_operand.hbm [shape: f32[16,256], index: 1, kind: input, shape index: {}]   ;;  %s743_s2 = inlined_call_operand.hbm [shape: f32[16,256], index: 2, kind: output, shape index: {}]  }
   0x1   :  { %9 = vsyncpa [#allocation3 + $0x1], 0 }
   0x2   :  { %10 = vsyncpa [#allocation4], 0 }
   0x3   :  { %12 = vsyncpa [#allocation4 + $0x1], 0  ;;  %s586_s9 = smov 0   ;;  %s588_s10 = smov 0  }
   0x4   :  { %s590_s11 = smov 0   ;;  %s592_s12 = smov 0  }
   0x5   :  { %s594_s13 = smov 0   ;;  %s596_s14 = smov 0  }
   0x6 LB: > { %s367_s15 = sadd.s32 4294967295, %s562_s14   ;;  %s368_s16 = sadd.s32 4294967294, %s562_s14   ;;  %s562_s14 = sphi %s596_s14, %s18_s14   ;;  %s558_s13 = sphi %s594_s13, %s755_s13   ;;  %s554_s12 = sphi %s592_s12, %s754_s12   ;;  %s550_s11 = sphi %s590_s11, %s753_s11   ;;  %s546_s10 = sphi %s588_s10, %s752_s10   ;;  %s542_s9 = sphi %s586_s9, %s751_s9  }
   0x7   : > { %s30_s17 = sadd.s32 1, %s558_s13  ;;  %s65_s18 = sadd.s32 1, %s550_s11 }
   0x8   : > { %p32_p0 = scmp.ge.s32.totalorder %s30_s17, 2  ;;  %p72_p1 = scmp.ne.s32.totalorder %s550_s11, %s546_s10 }
   0x9   : > { %p73_p2 = scmp.eq.s32.totalorder %s562_s14, 0  ;;  %p78_p3 = scmp.ne.s32.totalorder %s546_s10, %s542_s9 }
   0xa   : > { %s757_s17 = smov (%p32_p0, %s30_s17), 0  ;;  %p79_p5 = scmp.eq.s32.totalorder %s367_s15, 0 }
   0xb   : > { %p627_p4 = por %p73_p2, %p72_p1  ;;  %s60_s20 = ssub.s32 %s558_s13, %s757_s17 }
   0xc   : > { %p104_p6 = scmp.eq.s32.totalorder %s367_s15, 1  ;;  %p63_p7 = scmp.eq.s32.totalorder %s60_s20, 0 }
   0xd   : > { %p633_p8 = por %p79_p5, %p78_p3  ;;  %p110_p10 = scmp.eq.s32.totalorder %s368_s16, 1 }
   0xe   : > { %p637_p9 = por %p104_p6, %p72_p1  ;;  %p397_p13 = scmp.lt.s32.totalorder %s562_s14, 2 }
   0xf   : > { %s642_s23 = scalar_select %p63_p7, %s550_s11, %s65_s18  }
  0x10   : > { %p644_p11 = por %p110_p10, %p78_p3  ;;  %s137_s25 = sand.u32 1, %s550_s11  }
  0x11   : > { %s371_s26 = sshll.u32 %s137_s25, 4  ;;  %s383_s27 = sshll.u32 %s558_s13, 8 }
  0x12   : > { %s747_s24 = scalar_select %p644_p11, 1, 0 }
  0x13   : > { %s149_s30 = scalar_lea.hbm %s742_s1, %s383_s27  ;;  %s141_s3 = scalar_lea.vmem [#allocation2], %s371_s26 }
  0x14   : > { %s151_s4 = sshll.u32 %s141_s3, 4  ;;  %p657_p0 = pnand %p397_p13, %p627_p4  ;;  %s152_s4 = int_to_ptr.vmem [resolvable:$true] %s151_s4 }
  0x15   : > { %p374_p1 = scmp.ge.s32.totalorder %s562_s14, 1  ;;  %p156_p2 = scmp.lt.s32.totalorder %s562_s14, 3 }
  0x16   : > { %s138_s6 = scalar_lea.sflag [#allocation3], %s137_s25  ;;  %p456_p3 = pneg %p657_p0 }
  0x17   : > { %s467_s7 = scalar_lea.vmem %s152_s4, 256  ;;  %s564_s8 = smov [#allocation2]  }
  0x18   : > { %p468_p5 = scmp.ne.s32.totalorder %s152_s4, %s467_s7  ;;  %s472_s15 = sshll.u32 %s564_s8, 4  ;;  %s473_s15 = int_to_ptr.vmem [resolvable:$false] %s472_s15 }
  0x19   : > { %s474_s16 = scalar_lea.vmem %s473_s15, 512  ;;  %p475_p10 = scmp.lt.s32.totalorder %s152_s4, %s473_s15 }
  0x1a   : > { %p470_p6 = pnand %p468_p5, %p456_p3  ;;  %p476_p12 = scmp.lt.s32.totalorder %s474_s16, %s467_s7 }
  0x1c   : > { %p471_p7 = pneg %p470_p6  ;;  %p477_p4 = por %p476_p12, %p475_p10 }
  0x1e   : > { %p478_p13 = pnand %p477_p4, %p471_p7 }
  0x20   : > { %481 = shalt.err (!%p478_p13)
}
  0x21   : > { %392 = dma.hbm_to_vmem [thread:$0]  (!%p657_p0), %s149_s30, 256, %s152_s4, %s138_s6  }
  0x22   : > { %p157_p11 = pnand %p374_p1, %p156_p2 }
  0x23   : > { %s672_s18 = sand.u32 (!%p157_p11), 1, %s546_s10  }
  0x24   : > { %160 = sbr.rel (%p157_p11) target bundleno = 197 (0xc5), region = 28  ;;  %s375_s19 = sshll.u32 (!%p157_p11), %s672_s18, 4 }
  0x25   : > { %s163_s20 = scalar_lea.sflag (!%p157_p11), [#allocation3], %s672_s18  ;;  %s678_s25 = scalar_lea.vmem (!%p157_p11), [#allocation2], %s375_s19 }
  0x29   : > { %533 = dma.done.wait (%p633_p8), %s163_s20, 256  }
  0x2a   : > { %535 = vsyncadd (%p633_p8), %s163_s20, 4294967040  ;;  %p191_p11 = scmp.lt.s32.totalorder %s554_s12, 1  ;;  %v565_v0 = vmov 0   ;;  %v566_v2 = vmov 0.9   ;;  %v200_v10 = vlaneseq  ;;  %v197_v16 = vld [vmem:[%s678_s25] sm:$0xff] }
  0x2b   : > { %452 = vset.pattern.permute.xlu0 %v565_v0  ;;  %453 = vset.pattern.permute.xlu1 %v565_v0  ;;  %v567_v4 = vmov 0.0003937008   ;;  %v568_v6 = vmov -0.0030865825   ;;  %v569_v8 = vmov -0.09482446  }
  0x2c   : > { %s192_s26 = scalar_select %p191_p11, %s554_s12, 1  ;;  %v201_v11 = vand.u32 127, %v200_v10  ;;  %v198_v17 = vld [vmem:[%s678_s25 + $0x8] sm:$0xff] }
  0x2d   : > { %s384_s21 = sshll.u32 %s554_s12, 8  ;;  %s190_s3 = scalar_lea.vmem [#allocation5], %s375_s19 }
  0x2e   : > { %s377_s27 = sshll.u32 %s192_s26, 3  ;;  %v202_v12 = vadd.s32 128, %v201_v11  ;;  %vm218_vm1 = vcmp.eq.s32.totalorder %v201_v11, 0  ;;  %s271_s4 = sshll.u32 %s190_s3, 4  ;;  %s272_s4 = int_to_ptr.vmem [resolvable:$true] %s271_s4 }
  0x2f   : > { %s194_s30 = scalar_lea.vmem %s741_s0, %s377_s27  ;;  %s699_s7 = scalar_lea.hbm %s743_s2, %s384_s21 }
  0x30   : > { %v199_v1 = vld [vmem:[%s194_s30] sm:$0xff]  ;;  %s255_s12 = scalar_lea.sflag [#allocation4], %s672_s18  ;;  %s482_s8 = scalar_lea.vmem %s272_s4, 256 }
  0x31   : > { %213 = vperm.xlu0 %452, %v199_v1   ;;  %vm207_vm0 = vcmp.eq.s32.totalorder %v199_v1, 0  ;;  %p483_p8 = scmp.ne.s32.totalorder %s272_s4, %s482_s8  ;;  %s570_s15 = smov [#allocation5]  }
  0x32   : > { %v210_v3 = vsel %vm207_vm0, 0.0, %v566_v2  ;;  %v208_v5 = vsel %vm207_vm0, 0.0, %v567_v4  ;;  %v209_v7 = vsel %vm207_vm0, 0.0, %v568_v6  ;;  %v211_v9 = vsel %vm207_vm0, 0.0, %v569_v8  ;;  %s486_s16 = sshll.u32 %s570_s15, 4  ;;  %s487_s16 = int_to_ptr.vmem [resolvable:$false] %s486_s16 }
  0x33   : > { %229 = vperm.xlu1 %453, %v210_v3   ;;  %p484_p12 = pnand %p483_p8, %p637_p9  ;;  %s488_s19 = scalar_lea.vmem %s487_s16, 512 }
  0x34   : > { %p489_p1 = scmp.lt.s32.totalorder %s272_s4, %s487_s16  ;;  %p490_p2 = scmp.lt.s32.totalorder %s488_s19, %s482_s8 }
  0x35   : > { %222 = vperm.xlu0 %452, %v208_v5   ;;  %p485_p0 = pneg %p484_p12 }
  0x36   : > { %p491_p3 = por %p490_p2, %p489_p1 }
  0x37   : > { %236 = vperm.xlu1 %453, %v209_v7  }
  0x38   : > { %p492_p5 = pnand %p491_p3, %p485_p0 }
  0x39   : > { %243 = vperm.xlu0 %452, %v211_v9  }
  0xac   : > { %v214_v13 = vpop.permute.xlu0 %213 }
  0xad   : > { %vm216_vm2 = vcmp.eq.s32.totalorder %v202_v12, %v214_v13  ;;  %vm215_vm3 = vcmp.eq.s32.totalorder %v201_v11, %v214_v13 }
  0xae   : > { %v230_v14 = vpop.permute.xlu1 %229 }
  0xb0   : > { %v223_v15 = vpop.permute.xlu0 %222 }
  0xb1   : > { %v233_v18 = vsel %vm216_vm2, %v230_v14, %v223_v15  ;;  %v225_v19 = vsel %vm218_vm1, 0.0, %v223_v15 }
  0xb2   : > { %v237_v20 = vpop.permute.xlu1 %236  ;;  %v232_v21 = vsel %vm215_vm3, %v230_v14, %v225_v19  ;;  %v249_v24 = vmul.f32 %v233_v18, %v198_v17 }
  0xb3   : > { %v239_v22 = vsel %vm218_vm1, 0.0, %v237_v20  ;;  %v248_v23 = vmul.f32 %v232_v21, %v197_v16 }
  0xb4   : > { %v244_v25 = vpop.permute.xlu0 %243 }
  0xb5   : > { %v246_v26 = vsel %vm215_vm3, %v244_v25, %v239_v22  ;;  %v247_v27 = vsel %vm216_vm2, %v244_v25, %v237_v20 }
  0xb6   : > { %v250_v28 = vsub.f32 %v246_v26, %v248_v23  ;;  %v251_v29 = vsub.f32 %v247_v27, %v249_v24 }
  0xb8   : > { %252 = vst [vmem:[%s190_s3] sm:$0xff] %v250_v28  ;;  %253 = vst [vmem:[%s190_s3 + $0x8] sm:$0xff] %v251_v29 }
  0xb9   : > { %495 = shalt.err (!%p492_p5)
}
  0xba   : > { %s496_s20 = scalar_lea.hbm %s699_s7, 256  ;;  %s500_s26 = scalar_lea.hbm %s743_s2, 512 }
  0xbb   : > { %p497_p6 = scmp.ne.s32.totalorder %s699_s7, %s496_s20  ;;  %p501_p4 = scmp.lt.s32.totalorder %s699_s7, %s743_s2 }
  0xbc   : > { %p502_p13 = scmp.lt.s32.totalorder %s500_s26, %s496_s20 }
  0xbd   : > { %p498_p7 = pnand %p497_p6, %p637_p9 }
  0xbe   : > { %p503_p11 = por %p502_p13, %p501_p4 }
  0xbf   : > { %p499_p10 = pneg %p498_p7 }
  0xc1   : > { %p504_p8 = pnand %p503_p11, %p499_p10 }
  0xc3   : > { %507 = shalt.err (!%p504_p8)
}
  0xc4   : > { %387 = dma.vmem_to_hbm [thread:$0]  (%p637_p9), %s272_s4, 256, %s699_s7, %s255_s12  }
  0xc5 PF: > { %s283_s29 = sand.u32 1, %s542_s9   ;;  %p749_p12 = scmp.ne.s32.totalorder %s747_s24, 0 }
  0xc6   : > { %p750_p0 = scmp.ge.s32.totalorder %s562_s14, 2  ;;  %s284_s30 = scalar_lea.sflag [#allocation4], %s283_s29 }
  0xc8   : > { %p394_p1 = pnand %p750_p0, %p749_p12 }
  0xca   : > { %p395_p2 = pneg %p394_p1 }
  0xcc   : > { %537 = dma.done.wait (%p395_p2), %s284_s30, 256  }
  0xcd   : > { %539 = vsyncadd (%p395_p2), %s284_s30, 4294967040  ;;  %s18_s14 = sadd.s32 1, %s562_s14   ;;  %s751_s9 = smov %s546_s10 }
  0xce   : > { %p15_p3 = scmp.ge.s32.totalorder %s18_s14, 4   ;;  %s752_s10 = smov %s550_s11 }
  0xcf   : > { %s753_s11 = smov %s642_s23  ;;  %s754_s12 = smov %s558_s13 }
  0xd0   : > { %s755_s13 = smov %s757_s17  ;;  %17 = sbr.rel (!%p15_p3) target bundleno = 6 (0x6), region = 76 }
  0xd5   :  { %289 = vsyncpa [#allocation3], 1 }
  0xd6   :  { %291 = vsyncpa [#allocation3 + $0x1], 1 }
  0xd7   :  { %292 = vsyncpa [#allocation4], 1 }
  0xd8   :  { %294 = vsyncpa [#allocation4 + $0x1], 1 }

</bundles_post_ra>
